<compile_context>
chip_gen: v5e
topology: v5e:2x2
jax: 0.10.0
libtpu: 0.0.40
codegen_flags: <defaults>
</compile_context>

<pallas_src>
import jax
import jax.numpy as jnp
from jax.experimental import pallas as pl
from jax.experimental.pallas import tpu as pltpu


# ---------------------------------------------------------------------------
# Kernel: 4 MXU matmuls (trunk x3 + fused pitch|voice head) + VPU bias/ReLU.
# All weights/biases are VMEM-resident; accumulation is f32, operands bf16.
# ---------------------------------------------------------------------------
def multidnn_kernel(x_ref,
                    w0_ref, b0_ref,
                    w1_ref, b1_ref,
                    w2_ref, b2_ref,
                    wh_ref, bh_ref,
                    out_ref):
    # Activation arrives f32 (no wrapper astype round trip); cast in-register.
    x = x_ref[...].astype(jnp.bfloat16)

    h = jnp.dot(x, w0_ref[...], preferred_element_type=jnp.float32) + b0_ref[...]
    h = jnp.maximum(h, 0.0).astype(jnp.bfloat16)
    # TODO(synk): nn.Dropout is identity at inference; training-mode dropout
    # (pltpu.prng_random_bits masking) is intentionally not implemented.

    h = jnp.dot(h, w1_ref[...], preferred_element_type=jnp.float32) + b1_ref[...]
    h = jnp.maximum(h, 0.0).astype(jnp.bfloat16)

    h = jnp.dot(h, w2_ref[...], preferred_element_type=jnp.float32) + b2_ref[...]
    h = jnp.maximum(h, 0.0).astype(jnp.bfloat16)

    # Fused pitch+voice head: one 128-lane-dense matmul + one unmasked bf16 store.
    o = jnp.dot(h, wh_ref[...], preferred_element_type=jnp.float32) + bh_ref[...]
    out_ref[...] = jnp.maximum(o, 0.0).astype(out_ref.dtype)


# ---------------------------------------------------------------------------
# One-time parameter preparation (do NOT call per forward pass).
# ---------------------------------------------------------------------------
def _round_up(n, m):
    return ((n + m - 1) // m) * m


def prepare_params(params, compute_dtype=jnp.bfloat16):
    """Fuse the pitch/voice heads, zero-pad every lane-axis dim to a multiple of
    128, and cast weights to bf16 / biases to f32. Call once; reuse the result."""
    d_feature, d0 = params["w0"].shape
    d1 = params["w1"].shape[1]
    d2 = params["w2"].shape[1]
    n_pitch = params["wp"].shape[1]
    n_voice = params["wv"].shape[1]

    # Fuse the two heads into one lane-dense weight / bias (zero-padding => exact).
    wh = jnp.concatenate([params["wp"], params["wv"]], axis=1)
    bh = jnp.concatenate([params["bp"], params["bv"]], axis=1)

    dF_p = _round_up(d_feature, 128)
    d0_p = _round_up(d0, 128)
    d1_p = _round_up(d1, 128)
    d2_p = _round_up(d2, 128)
    nh_p = _round_up(n_pitch + n_voice, 128)

    def pad2(a, rows, cols):
        return jnp.pad(a, ((0, rows - a.shape[0]), (0, cols - a.shape[1])))

    prepped = {
        "w0": pad2(params["w0"], dF_p, d0_p).astype(compute_dtype),
        "w1": pad2(params["w1"], d0_p, d1_p).astype(compute_dtype),
        "w2": pad2(params["w2"], d1_p, d2_p).astype(compute_dtype),
        "wh": pad2(wh, d2_p, nh_p).astype(compute_dtype),
        "b0": pad2(params["b0"], 1, d0_p).astype(jnp.float32),
        "b1": pad2(params["b1"], 1, d1_p).astype(jnp.float32),
        "b2": pad2(params["b2"], 1, d2_p).astype(jnp.float32),
        "bh": pad2(bh, 1, nh_p).astype(jnp.float32),
    }
    dims = dict(d_feature=d_feature, dF_p=dF_p, d0_p=d0_p, d1_p=d1_p, d2_p=d2_p,
                nh_p=nh_p, n_pitch=n_pitch, n_voice=n_voice)
    return prepped, dims


# ---------------------------------------------------------------------------
# Per-call wrapper: pick batch tiling, pad batch if needed, launch the kernel.
# ---------------------------------------------------------------------------
def multidnn_forward(x, prepped, dims, *, tile_b=None):
    """x: (B, d_feature) float32.  prepped/dims: output of prepare_params().
    Returns (pitch, voice) in bfloat16."""
    B, d_feature = x.shape
    assert d_feature == dims["d_feature"], "feature dim mismatch vs prepared params"
    dF_p, d0_p, d1_p, d2_p, nh_p = (dims[k] for k in
                                    ("dF_p", "d0_p", "d1_p", "d2_p", "nh_p"))

    # --- Batch tiling: tiny B -> 1 tile; else >=2 balanced tiles, <=512 rows. ---
    if tile_b is None:
        if B <= 32:
            n_tiles = 1
        else:
            n_tiles = max(2, (B + 511) // 512)          # >=2 so v7x uses both TCs
        tile_b = _round_up((B + n_tiles - 1) // n_tiles, 16)   # bf16 packs 16 rows/vreg
    B_p = _round_up(max(B, tile_b), tile_b)

    xp = x
    if B_p != B or dF_p != d_feature:
        xp = jnp.pad(x, ((0, B_p - B), (0, dF_p - d_feature)))

    grid = (B_p // tile_b,)

    def rep(shape):
        # Weights/biases replicated across the batch grid (constant index map).
        # TODO(synk): pipeline_mode=pl.Buffered(1) would halve their VMEM footprint
        # once single-buffering is confirmed supported for pallas_call in this build.
        return pl.BlockSpec(shape, lambda i: (0, 0))

    # --- VMEM budget from actual buffer sizes (+ headroom), capped for v7x. ---
    w_bytes = 2 * (dF_p * d0_p + d0_p * d1_p + d1_p * d2_p + d2_p * nh_p)   # bf16
    b_bytes = 4 * (d0_p + d1_p + d2_p + nh_p)                               # f32
    io_bytes = 4 * tile_b * dF_p + 2 * tile_b * nh_p                        # f32 in, bf16 out
    need = 2 * (w_bytes + b_bytes + io_bytes)            # default double buffering
    vmem_limit = int(min(max(need + (8 << 20), 32 << 20), 56 << 20))

    out = pl.pallas_call(
        multidnn_kernel,
        grid_spec=pltpu.PrefetchScalarGridSpec(
            num_scalar_prefetch=0,
            grid=grid,
            in_specs=[
                pl.BlockSpec((tile_b, dF_p), lambda i: (i, 0)),   # x (f32)
                rep((dF_p, d0_p)), rep((1, d0_p)),                # W0, b0
                rep((d0_p, d1_p)), rep((1, d1_p)),                # W1, b1
                rep((d1_p, d2_p)), rep((1, d2_p)),                # W2, b2
                rep((d2_p, nh_p)), rep((1, nh_p)),                # fused head
            ],
            out_specs=pl.BlockSpec((tile_b, nh_p), lambda i: (i, 0)),
        ),
        out_shape=jax.ShapeDtypeStruct((B_p, nh_p), jnp.bfloat16),
        compiler_params=pltpu.CompilerParams(
            dimension_semantics=("parallel",),
            vmem_limit_bytes=vmem_limit,
        ),
    )(xp, prepped["w0"], prepped["b0"], prepped["w1"], prepped["b1"],
      prepped["w2"], prepped["b2"], prepped["wh"], prepped["bh"])

    n_pitch, n_voice = dims["n_pitch"], dims["n_voice"]
    pitch = out[:B, :n_pitch]
    voice = out[:B, n_pitch:n_pitch + n_voice]
    return pitch, voice


# ---------------------------------------------------------------------------
# Param init (Xavier normal, stored transposed as (in, out)) + pure-JAX reference.
# ---------------------------------------------------------------------------
def xavier_normal(key, fan_in, fan_out, dtype=jnp.float32):
    std = (2.0 / (fan_in + fan_out)) ** 0.5
    return std * jax.random.normal(key, (fan_in, fan_out), dtype=dtype)


def init_params(key, d_feature, d_hidden, n_pitch, n_voice):
    ks = jax.random.split(key, 5)
    h0, h1, h2 = d_hidden
    return {
        "w0": xavier_normal(ks[0], d_feature, h0), "b0": jnp.zeros((1, h0), jnp.float32),
        "w1": xavier_normal(ks[1], h0, h1),        "b1": jnp.zeros((1, h1), jnp.float32),
        "w2": xavier_normal(ks[2], h1, h2),        "b2": jnp.zeros((1, h2), jnp.float32),
        "wp": xavier_normal(ks[3], h2, n_pitch),   "bp": jnp.zeros((1, n_pitch), jnp.float32),
        "wv": xavier_normal(ks[4], h2, n_voice),   "bv": jnp.zeros((1, n_voice), jnp.float32),
    }


def reference_forward(x, params):
    """Pure-JAX reference mirroring the kernel's bf16-operand / f32-accumulate math."""
    def lin_relu(h, w, b):
        y = jnp.dot(h.astype(jnp.bfloat16), w.astype(jnp.bfloat16),
                    preferred_element_type=jnp.float32) + b
        return jnp.maximum(y, 0.0)
    h = lin_relu(x, params["w0"], params["b0"]).astype(jnp.bfloat16)
    h = lin_relu(h, params["w1"], params["b1"]).astype(jnp.bfloat16)
    h = lin_relu(h, params["w2"], params["b2"]).astype(jnp.bfloat16)
    return (lin_relu(h, params["wp"], params["bp"]),
            lin_relu(h, params["wv"], params["bv"]))


if __name__ == "__main__":
    # Small shapes consistent with the module's structure (real model uses
    # d_feature=1025, d_hidden=(2048, 2048, 1024), n_pitch=120, n_voice=2).
    B = 48                      # exercises the >=2-tile "parallel" batch grid
    d_feature = 200             # non-multiple of 128 -> exercises lane padding
    d_hidden = (256, 224, 128)  # middle layer exercises inner-dim padding
    n_pitch = 120
    n_voice = 2

    key = jax.random.PRNGKey(0)
    k_x, k_p = jax.random.split(key)
    x = jax.random.normal(k_x, (B, d_feature), dtype=jnp.float32)
    params = init_params(k_p, d_feature, d_hidden, n_pitch, n_voice)

    # One-time weight prep (fuse heads, pad, cast) — outside the per-call path.
    prepped, dims = prepare_params(params)

    fwd = jax.jit(lambda xx: multidnn_forward(xx, prepped, dims))
    pitch, voice = fwd(x)
    pitch, voice = jax.block_until_ready((pitch, voice))

    # Correctness check against a pure-JAX reference using the same bf16 math.
    ref_pitch, ref_voice = reference_forward(x, params)
    assert pitch.shape == (B, n_pitch) and voice.shape == (B, n_voice)
    assert jnp.allclose(pitch.astype(jnp.float32), ref_pitch, atol=3e-2, rtol=3e-2)
    assert jnp.allclose(voice.astype(jnp.float32), ref_voice, atol=3e-2, rtol=3e-2)

    print("KERNEL_OK")
</pallas_src>

<mosaic_0001>
module attributes {stable_mosaic.version = 11 : i64} {
  func.func @multidnn_kernel(%arg0: i32, %arg1: memref<32x256xf32, #tpu.memory_space<vmem>>, %arg2: memref<256x256xbf16, #tpu.memory_space<vmem>>, %arg3: memref<1x256xf32, #tpu.memory_space<vmem>>, %arg4: memref<256x256xbf16, #tpu.memory_space<vmem>>, %arg5: memref<1x256xf32, #tpu.memory_space<vmem>>, %arg6: memref<256x128xbf16, #tpu.memory_space<vmem>>, %arg7: memref<1x128xf32, #tpu.memory_space<vmem>>, %arg8: memref<128x128xbf16, #tpu.memory_space<vmem>>, %arg9: memref<1x128xf32, #tpu.memory_space<vmem>>, %arg10: memref<32x128xbf16, #tpu.memory_space<vmem>>) attributes {dimension_semantics = [#tpu.dimension_semantics<parallel>], iteration_bounds = array<i64: 2>, scalar_prefetch = 0 : i64, scratch_operands = 0 : i64, tpu.core_type = #tpu.core_type<tc>, window_params = [{transform_indices = @transform_0, window_bounds = array<i64: 32, 256>}, {pipeline_mode = #tpu.pipeline_mode<synchronous>, transform_indices = @transform_1, window_bounds = array<i64: 256, 256>}, {pipeline_mode = #tpu.pipeline_mode<synchronous>, transform_indices = @transform_2, window_bounds = array<i64: 1, 256>}, {pipeline_mode = #tpu.pipeline_mode<synchronous>, transform_indices = @transform_3, window_bounds = array<i64: 256, 256>}, {pipeline_mode = #tpu.pipeline_mode<synchronous>, transform_indices = @transform_4, window_bounds = array<i64: 1, 256>}, {pipeline_mode = #tpu.pipeline_mode<synchronous>, transform_indices = @transform_5, window_bounds = array<i64: 256, 128>}, {pipeline_mode = #tpu.pipeline_mode<synchronous>, transform_indices = @transform_6, window_bounds = array<i64: 1, 128>}, {pipeline_mode = #tpu.pipeline_mode<synchronous>, transform_indices = @transform_7, window_bounds = array<i64: 128, 128>}, {pipeline_mode = #tpu.pipeline_mode<synchronous>, transform_indices = @transform_8, window_bounds = array<i64: 1, 128>}, {transform_indices = @transform_9, window_bounds = array<i64: 32, 128>}]} {
    %c0 = arith.constant 0 : index
    %c0_0 = arith.constant 0 : index
    %0 = vector.load %arg1[%c0, %c0_0] : memref<32x256xf32, #tpu.memory_space<vmem>>, vector<32x256xf32>
    %1 = arith.truncf %0 : vector<32x256xf32> to vector<32x256xbf16>
    %c0_1 = arith.constant 0 : index
    %c0_2 = arith.constant 0 : index
    %2 = vector.load %arg2[%c0_1, %c0_2] : memref<256x256xbf16, #tpu.memory_space<vmem>>, vector<256x256xbf16>
    %cst = arith.constant dense<0.000000e+00> : vector<32x256xf32>
    %3 = tpu.matmul %1, %2, %cst {dimension_numbers = #tpu.dot_dimension_numbers<[1], [0], [0], [1], [0, 0, 1, 1], [], []>} : vector<32x256xbf16>, vector<256x256xbf16>, vector<32x256xf32> -> vector<32x256xf32>
    %c0_3 = arith.constant 0 : index
    %c0_4 = arith.constant 0 : index
    %4 = vector.load %arg3[%c0_3, %c0_4] : memref<1x256xf32, #tpu.memory_space<vmem>>, vector<1x256xf32>
    %5 = vector.broadcast %4 : vector<1x256xf32> to vector<32x256xf32>
    %6 = arith.addf %3, %5 : vector<32x256xf32>
    %cst_5 = arith.constant 0.000000e+00 : f32
    %7 = vector.broadcast %cst_5 : f32 to vector<32x256xf32>
    %8 = arith.maximumf %6, %7 : vector<32x256xf32>
    %9 = arith.truncf %8 : vector<32x256xf32> to vector<32x256xbf16>
    %c0_6 = arith.constant 0 : index
    %c0_7 = arith.constant 0 : index
    %10 = vector.load %arg4[%c0_6, %c0_7] : memref<256x256xbf16, #tpu.memory_space<vmem>>, vector<256x256xbf16>
    %cst_8 = arith.constant dense<0.000000e+00> : vector<32x256xf32>
    %11 = tpu.matmul %9, %10, %cst_8 {dimension_numbers = #tpu.dot_dimension_numbers<[1], [0], [0], [1], [0, 0, 1, 1], [], []>} : vector<32x256xbf16>, vector<256x256xbf16>, vector<32x256xf32> -> vector<32x256xf32>
    %c0_9 = arith.constant 0 : index
    %c0_10 = arith.constant 0 : index
    %12 = vector.load %arg5[%c0_9, %c0_10] : memref<1x256xf32, #tpu.memory_space<vmem>>, vector<1x256xf32>
    %13 = vector.broadcast %12 : vector<1x256xf32> to vector<32x256xf32>
    %14 = arith.addf %11, %13 : vector<32x256xf32>
    %cst_11 = arith.constant 0.000000e+00 : f32
    %15 = vector.broadcast %cst_11 : f32 to vector<32x256xf32>
    %16 = arith.maximumf %14, %15 : vector<32x256xf32>
    %17 = arith.truncf %16 : vector<32x256xf32> to vector<32x256xbf16>
    %c0_12 = arith.constant 0 : index
    %c0_13 = arith.constant 0 : index
    %18 = vector.load %arg6[%c0_12, %c0_13] : memref<256x128xbf16, #tpu.memory_space<vmem>>, vector<256x128xbf16>
    %cst_14 = arith.constant dense<0.000000e+00> : vector<32x128xf32>
    %19 = tpu.matmul %17, %18, %cst_14 {dimension_numbers = #tpu.dot_dimension_numbers<[1], [0], [0], [1], [0, 0, 1, 1], [], []>} : vector<32x256xbf16>, vector<256x128xbf16>, vector<32x128xf32> -> vector<32x128xf32>
    %c0_15 = arith.constant 0 : index
    %c0_16 = arith.constant 0 : index
    %20 = vector.load %arg7[%c0_15, %c0_16] : memref<1x128xf32, #tpu.memory_space<vmem>>, vector<1x128xf32>
    %21 = vector.broadcast %20 : vector<1x128xf32> to vector<32x128xf32>
    %22 = arith.addf %19, %21 : vector<32x128xf32>
    %cst_17 = arith.constant 0.000000e+00 : f32
    %23 = vector.broadcast %cst_17 : f32 to vector<32x128xf32>
    %24 = arith.maximumf %22, %23 : vector<32x128xf32>
    %25 = arith.truncf %24 : vector<32x128xf32> to vector<32x128xbf16>
    %c0_18 = arith.constant 0 : index
    %c0_19 = arith.constant 0 : index
    %26 = vector.load %arg8[%c0_18, %c0_19] : memref<128x128xbf16, #tpu.memory_space<vmem>>, vector<128x128xbf16>
    %cst_20 = arith.constant dense<0.000000e+00> : vector<32x128xf32>
    %27 = tpu.matmul %25, %26, %cst_20 {dimension_numbers = #tpu.dot_dimension_numbers<[1], [0], [0], [1], [0, 0, 1, 1], [], []>} : vector<32x128xbf16>, vector<128x128xbf16>, vector<32x128xf32> -> vector<32x128xf32>
    %c0_21 = arith.constant 0 : index
    %c0_22 = arith.constant 0 : index
    %28 = vector.load %arg9[%c0_21, %c0_22] : memref<1x128xf32, #tpu.memory_space<vmem>>, vector<1x128xf32>
    %29 = vector.broadcast %28 : vector<1x128xf32> to vector<32x128xf32>
    %30 = arith.addf %27, %29 : vector<32x128xf32>
    %cst_23 = arith.constant 0.000000e+00 : f32
    %31 = vector.broadcast %cst_23 : f32 to vector<32x128xf32>
    %32 = arith.maximumf %30, %31 : vector<32x128xf32>
    %33 = arith.truncf %32 : vector<32x128xf32> to vector<32x128xbf16>
    %c0_24 = arith.constant 0 : index
    %c0_25 = arith.constant 0 : index
    %34 = vector.load %arg10[%c0_24, %c0_25] : memref<32x128xbf16, #tpu.memory_space<vmem>>, vector<32x128xbf16>
    tpu.vector_store %arg10[%c0_24, %c0_25], %33 {strides = array<i32>} : memref<32x128xbf16, #tpu.memory_space<vmem>>, vector<32x128xbf16>,
    return
  }
  func.func @transform_0(%arg0: i32) -> (i32, i32) {
    %c0_i32 = arith.constant 0 : i32
    %c0_i32_0 = arith.constant 0 : i32
    return %arg0, %c0_i32 : i32, i32
  }
  func.func @transform_1(%arg0: i32) -> (i32, i32) {
    %c0_i32 = arith.constant 0 : i32
    %c0_i32_0 = arith.constant 0 : i32
    %c0_i32_1 = arith.constant 0 : i32
    return %c0_i32, %c0_i32_0 : i32, i32
  }
  func.func @transform_2(%arg0: i32) -> (i32, i32) {
    %c0_i32 = arith.constant 0 : i32
    %c0_i32_0 = arith.constant 0 : i32
    %c0_i32_1 = arith.constant 0 : i32
    return %c0_i32, %c0_i32_0 : i32, i32
  }
  func.func @transform_3(%arg0: i32) -> (i32, i32) {
    %c0_i32 = arith.constant 0 : i32
    %c0_i32_0 = arith.constant 0 : i32
    %c0_i32_1 = arith.constant 0 : i32
    return %c0_i32, %c0_i32_0 : i32, i32
  }
  func.func @transform_4(%arg0: i32) -> (i32, i32) {
    %c0_i32 = arith.constant 0 : i32
    %c0_i32_0 = arith.constant 0 : i32
    %c0_i32_1 = arith.constant 0 : i32
    return %c0_i32, %c0_i32_0 : i32, i32
  }
  func.func @transform_5(%arg0: i32) -> (i32, i32) {
    %c0_i32 = arith.constant 0 : i32
    %c0_i32_0 = arith.constant 0 : i32
    %c0_i32_1 = arith.constant 0 : i32
    return %c0_i32, %c0_i32_0 : i32, i32
  }
  func.func @transform_6(%arg0: i32) -> (i32, i32) {
    %c0_i32 = arith.constant 0 : i32
    %c0_i32_0 = arith.constant 0 : i32
    %c0_i32_1 = arith.constant 0 : i32
    return %c0_i32, %c0_i32_0 : i32, i32
  }
  func.func @transform_7(%arg0: i32) -> (i32, i32) {
    %c0_i32 = arith.constant 0 : i32
    %c0_i32_0 = arith.constant 0 : i32
    %c0_i32_1 = arith.constant 0 : i32
    return %c0_i32, %c0_i32_0 : i32, i32
  }
  func.func @transform_8(%arg0: i32) -> (i32, i32) {
    %c0_i32 = arith.constant 0 : i32
    %c0_i32_0 = arith.constant 0 : i32
    %c0_i32_1 = arith.constant 0 : i32
    return %c0_i32, %c0_i32_0 : i32, i32
  }
  func.func @transform_9(%arg0: i32) -> (i32, i32) {
    %c0_i32 = arith.constant 0 : i32
    %c0_i32_0 = arith.constant 0 : i32
    return %arg0, %c0_i32 : i32, i32
  }
}

</mosaic_0001>

<bundles_post_ra>
// kernel: _lambda_.1
= control target key start
LH: loop header
LB: loop body
LE: loop exit
PB: predicated region body
PF: predicated region fallthrough
CT: control target
= control target key end

     0   :  { %14 = vsyncpa [#allocation3], 0  ;;  %s2098_s0 = inlined_call_operand.vmem [shape: f32[64,256], index: 0, kind: input, shape index: {}]   ;;  %s2099_s1 = inlined_call_operand.hbm [shape: bf16[256,256], index: 1, kind: input, shape index: {}]   ;;  %s2100_s2 = inlined_call_operand.vmem [shape: f32[1,256], index: 2, kind: input, shape index: {}, may-alias: {2,4}]   ;;  %s2101_s3 = inlined_call_operand.hbm [shape: bf16[256,256], index: 3, kind: input, shape index: {}]   ;;  %s2102_s4 = inlined_call_operand.vmem [shape: f32[1,256], index: 4, kind: input, shape index: {}, may-alias: {2,4}]   ;;  %s2103_s5 = inlined_call_operand.vmem [shape: bf16[256,128], index: 5, kind: input, shape index: {}]   ;;  %s2104_s6 = inlined_call_operand.vmem [shape: f32[1,128], index: 6, kind: input, shape index: {}, may-alias: {6,8}]   ;;  %s2105_s7 = inlined_call_operand.vmem [shape: bf16[128,128], index: 7, kind: input, shape index: {}]   ;;  %s2106_s8 = inlined_call_operand.vmem [shape: f32[1,128], index: 8, kind: input, shape index: {}, may-alias: {6,8}]   ;;  %s2107_s9 = inlined_call_operand.vmem [shape: bf16[64,128], index: 9, kind: output, shape index: {}]  }
   0x1   :  { %15 = vsyncpa [#allocation5], 0  ;;  %s1949_s30 = smov 0  }
   0x2 LB: > { %s257_s12 = sshll.u32 %s2099_s1, 4  ;;  %s1310_s13 = sadd.s32 4294967295, %s1893_s30   ;;  %s1893_s30 = sphi %s1949_s30, %s21_s30   ;;  %s258_s12 = int_to_ptr.hbm [resolvable:$true] %s257_s12 }
   0x3   : > { %p1312_p0 = scmp.ge.s32.totalorder %s1893_s30, 1  ;;  %p246_p1 = scmp.lt.s32.totalorder %s1893_s30, 3 }
   0x4   : > { %p1960_p2 = scmp.eq.s32.totalorder %s1310_s13, 0  ;;  %s1895_s16 = smov [#allocation2]  }
   0x5   : > { %p1964_p3 = pnand %p1312_p0, %p246_p1  ;;  %s259_s17 = sshll.u32 %s1895_s16, 4  ;;  %s260_s17 = int_to_ptr.vmem [resolvable:$true] %s259_s17 }
   0x6   : > { %s274_s20 = sshll.u32 %s2101_s3, 4  ;;  %s1896_s21 = smov [#allocation4]   ;;  %s275_s20 = int_to_ptr.hbm [resolvable:$true] %s274_s20 }
   0x7   : > { %p1794_p4 = pneg %p1964_p3  ;;  %s276_s22 = sshll.u32 %s1896_s21, 4  ;;  %s277_s22 = int_to_ptr.vmem [resolvable:$true] %s276_s22 }
   0x8   : > { %s1897_s23 = smov 128   ;;  %s1898_s24 = smov 8  }
   0x9   : > { %p1795_p5 = pnand %p1960_p2, %p1794_p4  ;;  %317 = sbr.rel (%p1964_p3) target bundleno = 654 (0x28e), region = 56 }
   0xb   : > { %1797 = dma.hbm_to_vmem [thread:$0]  (!%p1795_p5), %s258_s12, 4096, %s260_s17, [#allocation3], %s1897_s23, %s1897_s23, %s1898_s24  }
   0xc   : > { %1800 = dma.hbm_to_vmem [thread:$0]  (!%p1795_p5), %s275_s20, 4096, %s277_s22, [#allocation5], %s1897_s23, %s1897_s23, %s1898_s24  }
   0xe   : > { %1884 = dma.done.wait (%p1960_p2), [#allocation3], 4096  }
   0xf   : > { %1886 = vsyncadd (%p1960_p2), [#allocation3], 4294963200 }
  0x10   : > { %1888 = dma.done.wait (%p1960_p2), [#allocation5], 4096  }
  0x11   : > { %1890 = vsyncadd (%p1960_p2), [#allocation5], 4294963200  ;;  %s1985_s25 = sshll.u32 %s1310_s13, 2  ;;  %v1382_v0 = vld [vmem:[#allocation2 + $0x70] sm:$0xf] }
  0x12   : > { %v1694_v1 = vld [vmem:[#allocation2 + $0x74] sm:$0xf0]  ;;  %v1446_v2 = vld [vmem:[#allocation2 + $0xf0] sm:$0xf]  ;;  %v1693_v5 = vld [vmem:[#allocation2 + $0x74] sm:$0xf] }
  0x13   : > { %v1383_v3 = vor.u32 %v1694_v1, %v1382_v0  ;;  %v1710_v4 = vld [vmem:[#allocation2 + $0xf4] sm:$0xf0]  ;;  %v1384_v6 = vld [vmem:[#allocation2 + $0x78] sm:$0xf0]  ;;  %v1709_v9 = vld [vmem:[#allocation2 + $0xf4] sm:$0xf] }
  0x14   : > { %v1447_v7 = vor.u32 %v1710_v4, %v1446_v2  ;;  %v1387_v8 = vor.u32 %v1693_v5, %v1384_v6  ;;  %v1448_v10 = vld [vmem:[#allocation2 + $0xf8] sm:$0xf0]  ;;  %v1374_v11 = vld [vmem:[#allocation2 + $0x60] sm:$0xf]  ;;  %v1692_v13 = vld [vmem:[#allocation2 + $0x64] sm:$0xf0] }
  0x15   : > { %583 = vmatpush.bf16.msra.mxu0 %v1383_v3  ;;  %v1451_v12 = vor.u32 %v1709_v9, %v1448_v10  ;;  %v1438_v14 = vld [vmem:[#allocation2 + $0xe0] sm:$0xf]  ;;  %v1708_v15 = vld [vmem:[#allocation2 + $0xe4] sm:$0xf0]  ;;  %v1375_v16 = vor.u32 %v1692_v13, %v1374_v11  ;;  %v1691_v18 = vld [vmem:[#allocation2 + $0x64] sm:$0xf] }
  0x16   : > { %602 = vmatpush.bf16.msra.mxu1 %v1447_v7  ;;  %621 = vmatpush.bf16.msra.mxu2 %v1387_v8  ;;  %v1439_v17 = vor.u32 %v1708_v15, %v1438_v14  ;;  %v1376_v19 = vld [vmem:[#allocation2 + $0x68] sm:$0xf0]  ;;  %v1707_v20 = vld [vmem:[#allocation2 + $0xe4] sm:$0xf]  ;;  %v1366_v23 = vld [vmem:[#allocation2 + $0x50] sm:$0xf] }
  0x17   : > { %640 = vmatpush.bf16.msra.mxu3 %v1451_v12  ;;  %v1379_v21 = vor.u32 %v1691_v18, %v1376_v19  ;;  %v1440_v22 = vld [vmem:[#allocation2 + $0xe8] sm:$0xf0]  ;;  %v1690_v24 = vld [vmem:[#allocation2 + $0x54] sm:$0xf0]  ;;  %v1430_v26 = vld [vmem:[#allocation2 + $0xd0] sm:$0xf] }
  0x18   : > { %v1443_v25 = vor.u32 %v1707_v20, %v1440_v22  ;;  %v1706_v27 = vld [vmem:[#allocation2 + $0xd4] sm:$0xf0]  ;;  %v1689_v28 = vld [vmem:[#allocation2 + $0x54] sm:$0xf]  ;;  %v1367_v29 = vor.u32 %v1690_v24, %v1366_v23  ;;  %v1368_v30 = vld [vmem:[#allocation2 + $0x58] sm:$0xf0] }
  0x19   : > { %584 = vmatpush.bf16.msra.mxu0 %v1375_v16  ;;  %v1705_v31 = vld [vmem:[#allocation2 + $0xd4] sm:$0xf]  ;;  %v1432_v32 = vld [vmem:[#allocation2 + $0xd8] sm:$0xf0]  ;;  %v1431_v33 = vor.u32 %v1706_v27, %v1430_v26  ;;  %v1371_v34 = vor.u32 %v1689_v28, %v1368_v30  ;;  %v1358_v35 = vld [vmem:[#allocation2 + $0x40] sm:$0xf] }
  0x1a   : > { %603 = vmatpush.bf16.msra.mxu1 %v1439_v17  ;;  %622 = vmatpush.bf16.msra.mxu2 %v1379_v21  ;;  %v1688_v36 = vld [vmem:[#allocation2 + $0x44] sm:$0xf0]  ;;  %v1422_v37 = vld [vmem:[#allocation2 + $0xc0] sm:$0xf]  ;;  %v1435_v38 = vor.u32 %v1705_v31, %v1432_v32  ;;  %v1687_v40 = vld [vmem:[#allocation2 + $0x44] sm:$0xf] }
  0x1b   : > { %641 = vmatpush.bf16.msra.mxu3 %v1443_v25  ;;  %v1704_v39 = vld [vmem:[#allocation2 + $0xc4] sm:$0xf0]  ;;  %v1360_v41 = vld [vmem:[#allocation2 + $0x48] sm:$0xf0]  ;;  %v1703_v42 = vld [vmem:[#allocation2 + $0xc4] sm:$0xf]  ;;  %v1359_v44 = vor.u32 %v1688_v36, %v1358_v35 }
  0x1c   : > { %v1424_v43 = vld [vmem:[#allocation2 + $0xc8] sm:$0xf0]  ;;  %p361_p6 = scmp.lt.s32.totalorder %s1985_s25, 7  ;;  %v1423_v45 = vor.u32 %v1704_v39, %v1422_v37  ;;  %v1363_v46 = vor.u32 %v1687_v40, %v1360_v41  ;;  %v1350_v47 = vld [vmem:[#allocation2 + $0x30] sm:$0xf] }
  0x1d   : > { %585 = vmatpush.bf16.msra.mxu0 %v1367_v29  ;;  %v1686_v48 = vld [vmem:[#allocation2 + $0x34] sm:$0xf0]  ;;  %v1414_v49 = vld [vmem:[#allocation2 + $0xb0] sm:$0xf]  ;;  %v1427_v50 = vor.u32 %v1703_v42, %v1424_v43  ;;  %v1685_v52 = vld [vmem:[#allocation2 + $0x34] sm:$0xf] }
  0x1e   : > { %604 = vmatpush.bf16.msra.mxu1 %v1431_v33  ;;  %623 = vmatpush.bf16.msra.mxu2 %v1371_v34  ;;  %v1702_v51 = vld [vmem:[#allocation2 + $0xb4] sm:$0xf0]  ;;  %v1352_v53 = vld [vmem:[#allocation2 + $0x38] sm:$0xf0]  ;;  %v1701_v54 = vld [vmem:[#allocation2 + $0xb4] sm:$0xf]  ;;  %v1351_v56 = vor.u32 %v1686_v48, %v1350_v47 }
  0x1f   : > { %642 = vmatpush.bf16.msra.mxu3 %v1435_v38  ;;  %v1416_v55 = vld [vmem:[#allocation2 + $0xb8] sm:$0xf0]  ;;  %s2111_s25 = smov (!%p361_p6, %s1985_s25), 7  ;;  %v1415_v57 = vor.u32 %v1702_v51, %v1414_v49  ;;  %v1355_v58 = vor.u32 %v1685_v52, %v1352_v53  ;;  %v1342_v59 = vld [vmem:[#allocation2 + $0x20] sm:$0xf] }
  0x20   : > { %v1684_v60 = vld [vmem:[#allocation2 + $0x24] sm:$0xf0]  ;;  %v1406_v61 = vld [vmem:[#allocation2 + $0xa0] sm:$0xf]  ;;  %v1419_v62 = vor.u32 %v1701_v54, %v1416_v55  ;;  %v1683_v0 = vld [vmem:[#allocation2 + $0x24] sm:$0xf] }
  0x21   : > { %586 = vmatpush.bf16.msra.mxu0 %v1359_v44  ;;  %v1700_v63 = vld [vmem:[#allocation2 + $0xa4] sm:$0xf0]  ;;  %v1344_v1 = vld [vmem:[#allocation2 + $0x28] sm:$0xf0]  ;;  %v1699_v2 = vld [vmem:[#allocation2 + $0xa4] sm:$0xf]  ;;  %v1343_v4 = vor.u32 %v1684_v60, %v1342_v59 }
  0x22   : > { %605 = vmatpush.bf16.msra.mxu1 %v1423_v45  ;;  %624 = vmatpush.bf16.msra.mxu2 %v1363_v46  ;;  %v1408_v3 = vld [vmem:[#allocation2 + $0xa8] sm:$0xf0]  ;;  %s1678_s26 = sshll.u32 %s2111_s25, 4  ;;  %v1407_v5 = vor.u32 %v1700_v63, %v1406_v61  ;;  %v1347_v6 = vor.u32 %v1683_v0, %v1344_v1  ;;  %v1334_v7 = vld [vmem:[#allocation2 + $0x10] sm:$0xf] }
  0x23   : > { %643 = vmatpush.bf16.msra.mxu3 %v1427_v50  ;;  %v1682_v8 = vld [vmem:[#allocation2 + $0x14] sm:$0xf0]  ;;  %v1398_v9 = vld [vmem:[#allocation2 + $0x90] sm:$0xf]  ;;  %v1411_v10 = vor.u32 %v1699_v2, %v1408_v3  ;;  %v1681_v12 = vld [vmem:[#allocation2 + $0x14] sm:$0xf]  ;;  %s1997_s29 = scalar_lea.vmem %s2098_s0, %s1678_s26 }
  0x24   : > { %v1698_v11 = vld [vmem:[#allocation2 + $0x94] sm:$0xf0]  ;;  %v1336_v13 = vld [vmem:[#allocation2 + $0x18] sm:$0xf0]  ;;  %v1697_v14 = vld [vmem:[#allocation2 + $0x94] sm:$0xf]  ;;  %v1335_v16 = vor.u32 %v1682_v8, %v1334_v7 }
  0x25   : > { %587 = vmatpush.bf16.msra.mxu0 %v1351_v56  ;;  %v1400_v15 = vld [vmem:[#allocation2 + $0x98] sm:$0xf0]  ;;  %v1326_v17 = vld [vmem:[#allocation2] sm:$0xf]  ;;  %v1680_v18 = vld [vmem:[#allocation2 + $0x4] sm:$0xf0]  ;;  %v1399_v19 = vor.u32 %v1698_v11, %v1398_v9  ;;  %v1339_v20 = vor.u32 %v1681_v12, %v1336_v13 }
  0x26   : > { %606 = vmatpush.bf16.msra.mxu1 %v1415_v57  ;;  %625 = vmatpush.bf16.msra.mxu2 %v1355_v58  ;;  %v1390_v21 = vld [vmem:[#allocation2 + $0x80] sm:$0xf]  ;;  %v1696_v22 = vld [vmem:[#allocation2 + $0x84] sm:$0xf0]  ;;  %v1679_v23 = vld [vmem:[#allocation2 + $0x4] sm:$0xf]  ;;  %v1403_v24 = vor.u32 %v1697_v14, %v1400_v15  ;;  %v1327_v31 = vor.u32 %v1680_v18, %v1326_v17 }
  0x27   : > { %644 = vmatpush.bf16.msra.mxu3 %v1419_v62  ;;  %v1328_v25 = vld [vmem:[#allocation2 + $0x8] sm:$0xf0]  ;;  %v1695_v26 = vld [vmem:[#allocation2 + $0x84] sm:$0xf]  ;;  %v1510_v29 = vld [vmem:[#allocation4 + $0x70] sm:$0xf]  ;;  %v1391_v35 = vor.u32 %v1696_v22, %v1390_v21 }
  0x28   : > { %v1392_v27 = vld [vmem:[#allocation2 + $0x88] sm:$0xf0]  ;;  %v373_v28 = vld [vmem:[%s1997_s29] sm:$0xff]  ;;  %v1726_v30 = vld [vmem:[#allocation4 + $0x74] sm:$0xf0]  ;;  %v1331_v36 = vor.u32 %v1679_v23, %v1328_v25 }
  0x29   : > { %588 = vmatpush.bf16.msra.mxu0 %v1343_v4  ;;  %v375_v32 = vld [vmem:[%s1997_s29 + $0x10] sm:$0xff]  ;;  %v1512_v34 = vld [vmem:[#allocation4 + $0x78] sm:$0xf0]  ;;  %v374_v37 = vld [vmem:[%s1997_s29 + $0x8] sm:$0xff]  ;;  %v1395_v39 = vor.u32 %v1695_v26, %v1392_v27  ;;  %v1511_v40 = vor.u32 %v1726_v30, %v1510_v29 }
  0x2a   : > { %607 = vmatpush.bf16.msra.mxu1 %v1407_v5  ;;  %626 = vmatpush.bf16.msra.mxu2 %v1347_v6  ;;  %v1725_v33 = vld [vmem:[#allocation4 + $0x74] sm:$0xf]  ;;  %v376_v38 = vld [vmem:[%s1997_s29 + $0x18] sm:$0xff]  ;;  %v1502_v41 = vld [vmem:[#allocation4 + $0x60] sm:$0xf]  ;;  %v381_v44 = vpack.c.bf16 %v375_v32, %v373_v28 }
  0x2b   : > { %645 = vmatpush.bf16.msra.mxu3 %v1411_v10  ;;  %v1574_v42 = vld [vmem:[#allocation4 + $0xf0] sm:$0xf]  ;;  %v1742_v43 = vld [vmem:[#allocation4 + $0xf4] sm:$0xf0]  ;;  %v1515_v45 = vor.u32 %v1725_v33, %v1512_v34  ;;  %v1724_v46 = vld [vmem:[#allocation4 + $0x64] sm:$0xf0]  ;;  %v382_v49 = vpack.c.bf16 %v376_v38, %v374_v37 }
  0x2c   : > { %v1741_v47 = vld [vmem:[#allocation4 + $0xf4] sm:$0xf]  ;;  %v1576_v48 = vld [vmem:[#allocation4 + $0xf8] sm:$0xf0]  ;;  %v1723_v50 = vld [vmem:[#allocation4 + $0x64] sm:$0xf]  ;;  %v1575_v52 = vor.u32 %v1742_v43, %v1574_v42  ;;  %v1503_v55 = vor.u32 %v1724_v46, %v1502_v41 }
  0x2d   : > { %589 = vmatpush.bf16.msra.mxu0 %v1335_v16  ;;  %v1504_v51 = vld [vmem:[#allocation4 + $0x68] sm:$0xf0]  ;;  %v1494_v53 = vld [vmem:[#allocation4 + $0x50] sm:$0xf]  ;;  %v1566_v54 = vld [vmem:[#allocation4 + $0xe0] sm:$0xf]  ;;  %v1579_v56 = vor.u32 %v1741_v47, %v1576_v48 }
  0x2e   : > { %608 = vmatpush.bf16.msra.mxu1 %v1399_v19  ;;  %627 = vmatpush.bf16.msra.mxu2 %v1339_v20  ;;  %v1740_v57 = vld [vmem:[#allocation4 + $0xe4] sm:$0xf0]  ;;  %v1507_v58 = vor.u32 %v1723_v50, %v1504_v51  ;;  %v1722_v59 = vld [vmem:[#allocation4 + $0x54] sm:$0xf0]  ;;  %v1739_v60 = vld [vmem:[#allocation4 + $0xe4] sm:$0xf] }
  0x2f   : > { %646 = vmatpush.bf16.msra.mxu3 %v1403_v24  ;;  %v1568_v61 = vld [vmem:[#allocation4 + $0xe8] sm:$0xf0]  ;;  %v1721_v62 = vld [vmem:[#allocation4 + $0x54] sm:$0xf]  ;;  %v1496_v63 = vld [vmem:[#allocation4 + $0x58] sm:$0xf0]  ;;  %v1567_v0 = vor.u32 %v1740_v57, %v1566_v54  ;;  %v1495_v1 = vor.u32 %v1722_v59, %v1494_v53 }
  0x30   : > { %v1571_v2 = vor.u32 %v1739_v60, %v1568_v61  ;;  %v1558_v3 = vld [vmem:[#allocation4 + $0xd0] sm:$0xf]  ;;  %v1738_v4 = vld [vmem:[#allocation4 + $0xd4] sm:$0xf0]  ;;  %v1499_v5 = vor.u32 %v1721_v62, %v1496_v63  ;;  %v1486_v6 = vld [vmem:[#allocation4 + $0x40] sm:$0xf] }
  0x31   : > { %590 = vmatpush.bf16.msra.mxu0 %v1327_v31  ;;  %v1720_v7 = vld [vmem:[#allocation4 + $0x44] sm:$0xf0]  ;;  %v1719_v8 = vld [vmem:[#allocation4 + $0x44] sm:$0xf]  ;;  %v1488_v9 = vld [vmem:[#allocation4 + $0x48] sm:$0xf0]  ;;  %v1559_v10 = vor.u32 %v1738_v4, %v1558_v3 }
  0x32   : > { %609 = vmatpush.bf16.msra.mxu1 %v1391_v35  ;;  %628 = vmatpush.bf16.msra.mxu2 %v1331_v36  ;;  %v1487_v11 = vor.u32 %v1720_v7, %v1486_v6  ;;  %v1491_v12 = vor.u32 %v1719_v8, %v1488_v9  ;;  %v377_v13 = vld [vmem:[%s1997_s29 + $0x20] sm:$0xff]  ;;  %v379_v14 = vld [vmem:[%s1997_s29 + $0x30] sm:$0xff]  ;;  %v378_v15 = vld [vmem:[%s1997_s29 + $0x28] sm:$0xff] }
  0x33   : > { %647 = vmatpush.bf16.msra.mxu3 %v1395_v39  ;;  %v380_v16 = vld [vmem:[%s1997_s29 + $0x38] sm:$0xff]  ;;  %v383_v17 = vpack.c.bf16 %v379_v14, %v377_v13  ;;  %v1737_v19 = vld [vmem:[#allocation4 + $0xd4] sm:$0xf]  ;;  %v1478_v22 = vld [vmem:[#allocation4 + $0x30] sm:$0xf]  ;;  %s1323_s29 = sshll.u32 %s2111_s25, 2 }
  0x34   : > { %591 = vmatmul.bf16.vlgmr.msra.gmra.mxu0 %v381_v44  ;;  %v384_v18 = vpack.c.bf16 %v380_v16, %v378_v15  ;;  %v1560_v20 = vld [vmem:[#allocation4 + $0xd8] sm:$0xf0]  ;;  %v1718_v23 = vld [vmem:[#allocation4 + $0x34] sm:$0xf0]  ;;  %v1717_v24 = vld [vmem:[#allocation4 + $0x34] sm:$0xf]  ;;  %s371_s12 = scalar_lea.vmem %s2107_s9, %s1323_s29 }
  0x35   : > { %869 = vmatpush.bf16.msrb.mxu0 %v1511_v40  ;;  %610 = vmatmul.bf16.vlgmr.msra.gmra.mxu1 %v382_v49  ;;  %v1563_v21 = vor.u32 %v1737_v19, %v1560_v20  ;;  %v1479_v25 = vor.u32 %v1718_v23, %v1478_v22  ;;  %v1480_v26 = vld [vmem:[#allocation4 + $0x38] sm:$0xf0]  ;;  %v1550_v28 = vld [vmem:[#allocation4 + $0xc0] sm:$0xf]  ;;  %v1736_v29 = vld [vmem:[#allocation4 + $0xc4] sm:$0xf0] }
  0x36   : > { %907 = vmatpush.bf16.msrb.mxu2 %v1515_v45  ;;  %648 = vmatmul.bf16.vlgmr.msra.gmra.mxu3 %v382_v49  ;;  %v1483_v27 = vor.u32 %v1717_v24, %v1480_v26  ;;  %v1735_v30 = vld [vmem:[#allocation4 + $0xc4] sm:$0xf]  ;;  %v1551_v31 = vor.u32 %v1736_v29, %v1550_v28  ;;  %v1552_v32 = vld [vmem:[#allocation4 + $0xc8] sm:$0xf0]  ;;  %v1470_v34 = vld [vmem:[#allocation4 + $0x20] sm:$0xf] }
  0x37   : > { %629 = vmatmul.bf16.vlgmr.msra.gmra.mxu2 %v381_v44  ;;  %888 = vmatpush.bf16.msrb.mxu1 %v1575_v52  ;;  %v1555_v33 = vor.u32 %v1735_v30, %v1552_v32  ;;  %v1716_v35 = vld [vmem:[#allocation4 + $0x24] sm:$0xf0]  ;;  %v1715_v37 = vld [vmem:[#allocation4 + $0x24] sm:$0xf]  ;;  %v1472_v38 = vld [vmem:[#allocation4 + $0x28] sm:$0xf0] }
  0x38   : > { %926 = vmatpush.bf16.msrb.mxu3 %v1579_v56  ;;  %v1471_v36 = vor.u32 %v1716_v35, %v1470_v34  ;;  %v1475_v39 = vor.u32 %v1715_v37, %v1472_v38  ;;  %v1542_v40 = vld [vmem:[#allocation4 + $0xb0] sm:$0xf]  ;;  %v1734_v41 = vld [vmem:[#allocation4 + $0xb4] sm:$0xf0]  ;;  %v1733_v42 = vld [vmem:[#allocation4 + $0xb4] sm:$0xf] }
  0x39   : > { %870 = vmatpush.bf16.msrb.mxu0 %v1503_v55  ;;  %v1543_v43 = vor.u32 %v1734_v41, %v1542_v40  ;;  %v1544_v44 = vld [vmem:[#allocation4 + $0xb8] sm:$0xf0]  ;;  %v1462_v46 = vld [vmem:[#allocation4 + $0x10] sm:$0xf]  ;;  %v1714_v47 = vld [vmem:[#allocation4 + $0x14] sm:$0xf0] }
  0x3a   : > { %908 = vmatpush.bf16.msrb.mxu2 %v1507_v58  ;;  %v1547_v45 = vor.u32 %v1733_v42, %v1544_v44  ;;  %v1713_v48 = vld [vmem:[#allocation4 + $0x14] sm:$0xf]  ;;  %v1463_v49 = vor.u32 %v1714_v47, %v1462_v46  ;;  %v1464_v50 = vld [vmem:[#allocation4 + $0x18] sm:$0xf0]  ;;  %v1534_v52 = vld [vmem:[#allocation4 + $0xa0] sm:$0xf] }
  0x3b   : > { %889 = vmatpush.bf16.msrb.mxu1 %v1567_v0  ;;  %v1467_v51 = vor.u32 %v1713_v48, %v1464_v50  ;;  %v1732_v53 = vld [vmem:[#allocation4 + $0xa4] sm:$0xf0]  ;;  %v1731_v54 = vld [vmem:[#allocation4 + $0xa4] sm:$0xf]  ;;  %v1536_v56 = vld [vmem:[#allocation4 + $0xa8] sm:$0xf0] }
  0x3c   : > { %927 = vmatpush.bf16.msrb.mxu3 %v1571_v2  ;;  %v1535_v55 = vor.u32 %v1732_v53, %v1534_v52  ;;  %v1539_v57 = vor.u32 %v1731_v54, %v1536_v56  ;;  %v1454_v58 = vld [vmem:[#allocation4] sm:$0xf]  ;;  %v1712_v59 = vld [vmem:[#allocation4 + $0x4] sm:$0xf0]  ;;  %v1711_v60 = vld [vmem:[#allocation4 + $0x4] sm:$0xf] }
  0x3d   : > { %871 = vmatpush.bf16.msrb.mxu0 %v1495_v1  ;;  %v1455_v61 = vor.u32 %v1712_v59, %v1454_v58  ;;  %v1456_v62 = vld [vmem:[#allocation4 + $0x8] sm:$0xf0]  ;;  %v1526_v0 = vld [vmem:[#allocation4 + $0x90] sm:$0xf]  ;;  %v1730_v1 = vld [vmem:[#allocation4 + $0x94] sm:$0xf0] }
  0x3e   : > { %909 = vmatpush.bf16.msrb.mxu2 %v1499_v5  ;;  %v1459_v63 = vor.u32 %v1711_v60, %v1456_v62  ;;  %v1729_v2 = vld [vmem:[#allocation4 + $0x94] sm:$0xf]  ;;  %v1527_v3 = vor.u32 %v1730_v1, %v1526_v0  ;;  %v1528_v4 = vld [vmem:[#allocation4 + $0x98] sm:$0xf0]  ;;  %v1518_v6 = vld [vmem:[#allocation4 + $0x80] sm:$0xf] }
  0x3f   : > { %890 = vmatpush.bf16.msrb.mxu1 %v1559_v10  ;;  %v1531_v5 = vor.u32 %v1729_v2, %v1528_v4  ;;  %v1728_v7 = vld [vmem:[#allocation4 + $0x84] sm:$0xf0]  ;;  %v1727_v8 = vld [vmem:[#allocation4 + $0x84] sm:$0xf]  ;;  %v1520_v10 = vld [vmem:[#allocation4 + $0x88] sm:$0xf0] }
  0x40   : > { %928 = vmatpush.bf16.msrb.mxu3 %v1563_v21  ;;  %v1519_v9 = vor.u32 %v1728_v7, %v1518_v6  ;;  %v1750_v21 = vld [vmem:[%s2103_s5 + $0x38] sm:$0xff]  ;;  %v1749_v26 = vld [vmem:[%s2103_s5 + $0x30] sm:$0xff]  ;;  %v1747_v0 = vld [vmem:[%s2103_s5 + $0x20] sm:$0xff] }
  0x41   : > { %872 = vmatpush.bf16.msrb.mxu0 %v1487_v11  ;;  %v1523_v11 = vor.u32 %v1727_v8, %v1520_v10  ;;  %v1758_v22 = vld [vmem:[%s2103_s5 + $0x78] sm:$0xff]  ;;  %v1756_v1 = vld [vmem:[%s2103_s5 + $0x68] sm:$0xff]  ;;  %v1745_v4 = vld [vmem:[%s2103_s5 + $0x10] sm:$0xff] }
  0x42   : > { %910 = vmatpush.bf16.msrb.mxu2 %v1491_v12  ;;  %v417_v12 = vld [vmem:[%s2100_s2] sm:$0x3]  ;;  %v1746_v2 = vld [vmem:[%s2103_s5 + $0x18] sm:$0xff]  ;;  %v1744_v6 = vld [vmem:[%s2103_s5 + $0x8] sm:$0xff] }
  0x43   : > { %891 = vmatpush.bf16.msrb.mxu1 %v1551_v31  ;;  %v419_v14 = vperm.slane %v417_v12, 0  ;;  %v1748_v31 = vld [vmem:[%s2103_s5 + $0x28] sm:$0xff]  ;;  %v1753_v7 = vld [vmem:[%s2103_s5 + $0x50] sm:$0xff]  ;;  %v1743_v8 = vld [vmem:[%s2103_s5] sm:$0xff] }
  0x44   : > { %596 = vmatmul.bf16.gmra.mxu0 %v383_v17  ;;  %929 = vmatpush.bf16.msrb.mxu3 %v1555_v33  ;;  %v1751_v10 = vld [vmem:[%s2103_s5 + $0x40] sm:$0xff] }
  0x45   : > { %615 = vmatmul.bf16.gmra.mxu1 %v384_v18  ;;  %873 = vmatpush.bf16.msrb.mxu0 %v1479_v25 }
  0x46   : > { %653 = vmatmul.bf16.gmra.mxu3 %v384_v18  ;;  %911 = vmatpush.bf16.msrb.mxu2 %v1483_v27  ;;  %v420_v18 = vperm.slane %v417_v12, 1  ;;  %v703_v12 = vld [vmem:[%s2102_s4] sm:$0x3] }
  0x47   : > { %634 = vmatmul.bf16.gmra.mxu2 %v383_v17  ;;  %892 = vmatpush.bf16.msrb.mxu1 %v1543_v43 }
  0x48   : > { %930 = vmatpush.bf16.msrb.mxu3 %v1547_v45 }
  0x49   : > { %874 = vmatpush.bf16.msrb.mxu0 %v1471_v36 }
  0x4a   : > { %912 = vmatpush.bf16.msrb.mxu2 %v1475_v39 }
  0x4b   : > { %893 = vmatpush.bf16.msrb.mxu1 %v1535_v55 }
  0x4c   : > { %931 = vmatpush.bf16.msrb.mxu3 %v1539_v57 }
  0x4d   : > { %875 = vmatpush.bf16.msrb.mxu0 %v1463_v49 }
  0x4e   : > { %913 = vmatpush.bf16.msrb.mxu2 %v1467_v51 }
  0x4f   : > { %894 = vmatpush.bf16.msrb.mxu1 %v1527_v3  ;;  %v1755_v3 = vld [vmem:[%s2103_s5 + $0x60] sm:$0xff] }
  0x50   : > { %932 = vmatpush.bf16.msrb.mxu3 %v1531_v5  ;;  %v1754_v5 = vld [vmem:[%s2103_s5 + $0x58] sm:$0xff] }
  0x51   : > { %876 = vmatpush.bf16.msrb.mxu0 %v1455_v61 }
  0x52   : > { %914 = vmatpush.bf16.msrb.mxu2 %v1459_v63  ;;  %v1757_v63 = vld [vmem:[%s2103_s5 + $0x70] sm:$0xff] }
  0x53   : > { %895 = vmatpush.bf16.msrb.mxu1 %v1519_v9  ;;  %v1752_v9 = vld [vmem:[%s2103_s5 + $0x48] sm:$0xff] }
  0x54   : > { %933 = vmatpush.bf16.msrb.mxu3 %v1523_v11 }
  0x55   : > { %1089 = vmatpush.bf16.msra.mxu0 %v1750_v21 }
  0x57   : > { %1108 = vmatpush.bf16.msra.mxu1 %v1758_v22 }
  0x58   : > { %1778 = vmatpush.bf16.msra.mxu3 %v1750_v21  ;;  %v706_v21 = vperm.slane %v703_v12, 1 }
  0x59   : > { %1090 = vmatpush.bf16.msra.mxu0 %v1749_v26 }
  0x5b   : > { %1109 = vmatpush.bf16.msra.mxu1 %v1757_v63  ;;  %v1761_v63 = vld [vmem:[%s2105_s7 + $0x10] sm:$0xff] }
  0x5c   : > { %1779 = vmatpush.bf16.msra.mxu3 %v1749_v26 }
  0x5d   : > { %1091 = vmatpush.bf16.msra.mxu0 %v1748_v31 }
  0x5f   : > { %1110 = vmatpush.bf16.msra.mxu1 %v1756_v1  ;;  %v1759_v1 = vld [vmem:[%s2105_s7] sm:$0xff] }
  0x60   : > { %1780 = vmatpush.bf16.msra.mxu3 %v1748_v31  ;;  %v1764_v31 = vld [vmem:[%s2105_s7 + $0x28] sm:$0xff] }
  0x61   : > { %1092 = vmatpush.bf16.msra.mxu0 %v1747_v0 }
  0x63   : > { %1111 = vmatpush.bf16.msra.mxu1 %v1755_v3 }
  0x64   : > { %1781 = vmatpush.bf16.msra.mxu3 %v1747_v0  ;;  %v1760_v0 = vld [vmem:[%s2105_s7 + $0x8] sm:$0xff] }
  0x65   : > { %1093 = vmatpush.bf16.msra.mxu0 %v1746_v2 }
  0x67   : > { %1112 = vmatpush.bf16.msra.mxu1 %v1754_v5 }
  0x68   : > { %1782 = vmatpush.bf16.msra.mxu3 %v1746_v2 }
  0x69   : > { %1094 = vmatpush.bf16.msra.mxu0 %v1745_v4 }
  0x6b   : > { %1113 = vmatpush.bf16.msra.mxu1 %v1753_v7 }
  0x6c   : > { %1783 = vmatpush.bf16.msra.mxu3 %v1745_v4  ;;  %v1817_v4 = vld [vmem:[%s2104_s6] ss:$0 sm:$0xff] }
  0x6d   : > { %1095 = vmatpush.bf16.msra.mxu0 %v1744_v6 }
  0x6f   : > { %1114 = vmatpush.bf16.msra.mxu1 %v1752_v9 }
  0x70   : > { %1784 = vmatpush.bf16.msra.mxu3 %v1744_v6 }
  0x71   : > { %1096 = vmatpush.bf16.msra.mxu0 %v1743_v8 }
  0x73   : > { %1115 = vmatpush.bf16.msra.mxu1 %v1751_v10 }
  0x74   : > { %1785 = vmatpush.bf16.msra.mxu3 %v1743_v8 }
  0xb1   : > { %v592_v13 = vpop.f32.mrf.mxu0 }
  0xb2   : > { %v611_v15 = vpop.f32.mrf.mxu1  ;;  %v593_v16 = vadd.f32 %v592_v13, %v419_v14 }
  0xb4   : > { %v612_v23 = vadd.f32 %v611_v15, %v593_v16  ;;  %v705_v15 = vperm.slane %v703_v12, 0 }
  0xb6   : > { %v659_v29 = vmax.f32 %v612_v23, 0.0 }
  0xb9   : > { %v649_v19 = vpop.f32.mrf.mxu3  ;;  %v594_v20 = vpop.f32.mrf.mxu0 }
  0xba   : > { %v630_v17 = vpop.f32.mrf.mxu2  ;;  %v595_v24 = vadd.f32 %v594_v20, %v419_v14  ;;  %v613_v25 = vpop.f32.mrf.mxu1 }
  0xbb   : > { %v631_v28 = vadd.f32 %v630_v17, %v420_v18 }
  0xbc   : > { %v614_v27 = vadd.f32 %v613_v25, %v595_v24  ;;  %v1765_v24 = vld [vmem:[%s2105_s7 + $0x30] sm:$0xff] }
  0xbd   : > { %v650_v34 = vadd.f32 %v649_v19, %v631_v28 }
  0xbe   : > { %v661_v30 = vmax.f32 %v614_v27, 0.0 }
  0xbf   : > { %v660_v40 = vmax.f32 %v650_v34, 0.0 }
  0xc0   : > { %v667_v32 = vpack.c.bf16 %v661_v30, %v659_v29 }
  0xc1   : > { %v651_v36 = vpop.f32.mrf.mxu3  ;;  %v597_v37 = vpop.f32.mrf.mxu0 }
  0xc2   : > { %v632_v33 = vpop.f32.mrf.mxu2  ;;  %v616_v38 = vpop.f32.mrf.mxu1  ;;  %877 = vmatmul.bf16.vlgmr.msrb.gmra.mxu0 %v667_v32  ;;  %915 = vmatmul.bf16.vlgmr.msrb.gmra.mxu2 %v667_v32  ;;  %v598_v42 = vadd.f32 %v597_v37, %v419_v14 }
  0xc3   : > { %v633_v35 = vadd.f32 %v632_v33, %v420_v18 }
  0xc4   : > { %v617_v47 = vadd.f32 %v616_v38, %v598_v42 }
  0xc5   : > { %v652_v39 = vadd.f32 %v651_v36, %v633_v35 }
  0xc6   : > { %v663_v52 = vmax.f32 %v617_v47, 0.0 }
  0xc7   : > { %v662_v41 = vmax.f32 %v652_v39, 0.0 }
  0xc9   : > { %v668_v43 = vpack.c.bf16 %v662_v41, %v660_v40  ;;  %v654_v45 = vpop.f32.mrf.mxu3  ;;  %v599_v46 = vpop.f32.mrf.mxu0 }
  0xca   : > { %v635_v44 = vpop.f32.mrf.mxu2  ;;  %v600_v48 = vadd.f32 %v599_v46, %v419_v14  ;;  %v618_v49 = vpop.f32.mrf.mxu1 }
  0xcb   : > { %896 = vmatmul.bf16.vlgmr.msrb.gmra.mxu1 %v668_v43  ;;  %934 = vmatmul.bf16.vlgmr.msrb.gmra.mxu3 %v668_v43  ;;  %v636_v51 = vadd.f32 %v635_v44, %v420_v18 }
  0xcc   : > { %v619_v50 = vadd.f32 %v618_v49, %v600_v48 }
  0xcd   : > { %v655_v56 = vadd.f32 %v654_v45, %v636_v51 }
  0xce   : > { %v665_v53 = vmax.f32 %v619_v50, 0.0 }
  0xcf   : > { %v664_v60 = vmax.f32 %v655_v56, 0.0 }
  0xd0   : > { %v669_v55 = vpack.c.bf16 %v665_v53, %v663_v52 }
  0xd1   : > { %v656_v58 = vpop.f32.mrf.mxu3 }
  0xd2   : > { %v637_v54 = vpop.f32.mrf.mxu2  ;;  %882 = vmatmul.bf16.gmra.mxu0 %v669_v55  ;;  %920 = vmatmul.bf16.gmra.mxu2 %v669_v55 }
  0xd3   : > { %v638_v57 = vadd.f32 %v637_v54, %v420_v18  ;;  %v1766_v18 = vld [vmem:[%s2105_s7 + $0x38] sm:$0xff] }
  0xd4   : > { %1201 = vmatpush.bf16.msra.mxu2 %v1766_v18 }
  0xd5   : > { %v657_v59 = vadd.f32 %v656_v58, %v638_v57 }
  0xd7   : > { %v666_v61 = vmax.f32 %v657_v59, 0.0 }
  0xd8   : > { %1202 = vmatpush.bf16.msra.mxu2 %v1765_v24 }
  0xd9   : > { %v670_v62 = vpack.c.bf16 %v666_v61, %v664_v60  ;;  %v1763_v61 = vld [vmem:[%s2105_s7 + $0x20] sm:$0xff] }
  0xdb   : > { %901 = vmatmul.bf16.gmra.mxu1 %v670_v62  ;;  %939 = vmatmul.bf16.gmra.mxu3 %v670_v62  ;;  %v1762_v62 = vld [vmem:[%s2105_s7 + $0x18] sm:$0xff] }
  0xdc   : > { %1203 = vmatpush.bf16.msra.mxu2 %v1764_v31 }
  0xe0   : > { %1204 = vmatpush.bf16.msra.mxu2 %v1763_v61 }
  0xe4   : > { %1205 = vmatpush.bf16.msra.mxu2 %v1762_v62 }
  0xe8   : > { %1206 = vmatpush.bf16.msra.mxu2 %v1761_v63 }
  0xec   : > { %1207 = vmatpush.bf16.msra.mxu2 %v1760_v0 }
  0xf0   : > { %1208 = vmatpush.bf16.msra.mxu2 %v1759_v1 }
 0x13f   : > { %v878_v11 = vpop.f32.mrf.mxu0 }
 0x140   : > { %v879_v17 = vadd.f32 %v878_v11, %v705_v15 }
 0x145   : > { %v916_v13 = vpop.f32.mrf.mxu2 }
 0x146   : > { %v917_v29 = vadd.f32 %v916_v13, %v706_v21 }
 0x147   : > { %v880_v16 = vpop.f32.mrf.mxu0 }
 0x148   : > { %v897_v14 = vpop.f32.mrf.mxu1  ;;  %v881_v22 = vadd.f32 %v880_v16, %v705_v15 }
 0x149   : > { %v898_v20 = vadd.f32 %v897_v14, %v879_v17 }
 0x14b   : > { %v945_v28 = vmax.f32 %v898_v20, 0.0 }
 0x14d   : > { %v918_v23 = vpop.f32.mrf.mxu2 }
 0x14e   : > { %v935_v19 = vpop.f32.mrf.mxu3  ;;  %v919_v34 = vadd.f32 %v918_v23, %v706_v21 }
 0x14f   : > { %v883_v27 = vpop.f32.mrf.mxu0  ;;  %v936_v32 = vadd.f32 %v935_v19, %v917_v29 }
 0x150   : > { %v899_v25 = vpop.f32.mrf.mxu1  ;;  %v884_v43 = vadd.f32 %v883_v27, %v705_v15 }
 0x151   : > { %v900_v26 = vadd.f32 %v899_v25, %v881_v22  ;;  %v946_v39 = vmax.f32 %v936_v32, 0.0 }
 0x153   : > { %v947_v30 = vmax.f32 %v900_v26, 0.0  ;;  %v1818_v26 = vld [vmem:[%s2106_s8] ss:$0 sm:$0xff] }
 0x155   : > { %v953_v33 = vpack.c.bf16 %v947_v30, %v945_v28  ;;  %v921_v38 = vpop.f32.mrf.mxu2 }
 0x156   : > { %v937_v35 = vpop.f32.mrf.mxu3  ;;  %v922_v51 = vadd.f32 %v921_v38, %v706_v21 }
 0x157   : > { %v938_v36 = vadd.f32 %v937_v35, %v919_v34  ;;  %1097 = vmatmul.bf16.vlgmr.msra.gmra.mxu0 %v953_v33  ;;  %v885_v42 = vpop.f32.mrf.mxu0 }
 0x158   : > { %v902_v37 = vpop.f32.mrf.mxu1  ;;  %v886_v46 = vadd.f32 %v885_v42, %v705_v15 }
 0x159   : > { %v948_v40 = vmax.f32 %v938_v36, 0.0  ;;  %v903_v45 = vadd.f32 %v902_v37, %v884_v43 }
 0x15b   : > { %v954_v41 = vpack.c.bf16 %v948_v40, %v946_v39  ;;  %v949_v50 = vmax.f32 %v903_v45, 0.0 }
 0x15d   : > { %1116 = vmatmul.bf16.vlgmr.msra.gmra.mxu1 %v954_v41  ;;  %v923_v49 = vpop.f32.mrf.mxu2 }
 0x15e   : > { %v940_v44 = vpop.f32.mrf.mxu3  ;;  %v924_v55 = vadd.f32 %v923_v49, %v706_v21 }
 0x15f   : > { %v941_v53 = vadd.f32 %v940_v44, %v922_v51 }
 0x160   : > { %v904_v47 = vpop.f32.mrf.mxu1 }
 0x161   : > { %v905_v48 = vadd.f32 %v904_v47, %v886_v46  ;;  %v950_v58 = vmax.f32 %v941_v53, 0.0 }
 0x163   : > { %v951_v52 = vmax.f32 %v905_v48, 0.0 }
 0x165   : > { %v955_v54 = vpack.c.bf16 %v951_v52, %v949_v50 }
 0x166   : > { %v942_v56 = vpop.f32.mrf.mxu3 }
 0x167   : > { %v943_v57 = vadd.f32 %v942_v56, %v924_v55  ;;  %1102 = vmatmul.bf16.vlgmr.msra.gmra.mxu3 %v955_v54 }
 0x169   : > { %v952_v59 = vmax.f32 %v943_v57, 0.0 }
 0x16b   : > { %v956_v60 = vpack.c.bf16 %v952_v59, %v950_v58 }
 0x16d   : > { %1121 = vmatmul.bf16.gmra.mxu1 %v956_v60 }
 0x1d4   : > { %v1098_v2 = vpop.f32.mrf.mxu0 }
 0x1d5   : > { %v1099_v6 = vadd.f32 %v1817_v4, %v1098_v2 }
 0x1da   : > { %v1117_v3 = vpop.f32.mrf.mxu1 }
 0x1db   : > { %v1118_v7 = vadd.f32 %v1117_v3, %v1099_v6 }
 0x1dc   : > { %v1100_v5 = vpop.f32.mrf.mxu0 }
 0x1dd   : > { %v1101_v8 = vadd.f32 %v1817_v4, %v1100_v5  ;;  %v1127_v11 = vmax.f32 %v1118_v7, 0.0 }
 0x1e2   : > { %v1119_v9 = vpop.f32.mrf.mxu1 }
 0x1e3   : > { %v1120_v10 = vadd.f32 %v1119_v9, %v1101_v8 }
 0x1e5   : > { %v1128_v12 = vmax.f32 %v1120_v10, 0.0 }
 0x1e7   : > { %v1131_v13 = vpack.c.bf16 %v1128_v12, %v1127_v11 }
 0x1e9   : > { %1209 = vmatmul.bf16.vlgmr.msra.gmra.mxu2 %v1131_v13 }
 0x1ea   : > { %v1103_v14 = vpop.f32.mrf.mxu3  ;;  %v1122_v15 = vpop.f32.mrf.mxu1 }
 0x1eb   : > { %v1104_v16 = vadd.f32 %v1817_v4, %v1103_v14 }
 0x1ed   : > { %v1123_v18 = vadd.f32 %v1122_v15, %v1104_v16 }
 0x1ef   : > { %v1129_v22 = vmax.f32 %v1123_v18, 0.0 }
 0x1f2   : > { %v1105_v17 = vpop.f32.mrf.mxu3  ;;  %v1124_v20 = vpop.f32.mrf.mxu1 }
 0x1f3   : > { %v1106_v19 = vadd.f32 %v1817_v4, %v1105_v17 }
 0x1f5   : > { %v1125_v21 = vadd.f32 %v1124_v20, %v1106_v19 }
 0x1f7   : > { %v1130_v23 = vmax.f32 %v1125_v21, 0.0 }
 0x1f9   : > { %v1132_v24 = vpack.c.bf16 %v1130_v23, %v1129_v22 }
 0x1fb   : > { %1214 = vmatmul.bf16.gmra.mxu2 %v1132_v24 }
 0x26c   : > { %v1210_v25 = vpop.f32.mrf.mxu2 }
 0x26d   : > { %v1211_v27 = vadd.f32 %v1818_v26, %v1210_v25 }
 0x26f   : > { %v1220_v30 = vmax.f32 %v1211_v27, 0.0 }
 0x274   : > { %v1212_v28 = vpop.f32.mrf.mxu2 }
 0x275   : > { %v1213_v29 = vadd.f32 %v1818_v26, %v1212_v28 }
 0x277   : > { %v1221_v31 = vmax.f32 %v1213_v29, 0.0 }
 0x279   : > { %v1770_v32 = vpack.c.bf16 %v1221_v31, %v1220_v30 }
 0x27b   : > { %1771 = vst [vmem:[%s371_s12] sm:$0xff] %v1770_v32  }
 0x27e   : > { %v1215_v33 = vpop.f32.mrf.mxu2 }
 0x27f   : > { %v1216_v34 = vadd.f32 %v1818_v26, %v1215_v33 }
 0x281   : > { %v1222_v37 = vmax.f32 %v1216_v34, 0.0 }
 0x286   : > { %v1217_v35 = vpop.f32.mrf.mxu2 }
 0x287   : > { %v1218_v36 = vadd.f32 %v1818_v26, %v1217_v35 }
 0x289   : > { %v1223_v38 = vmax.f32 %v1218_v36, 0.0 }
 0x28b   : > { %v1775_v39 = vpack.c.bf16 %v1223_v38, %v1222_v37 }
 0x28d   : > { %1777 = vst [vmem:[%s371_s12 + $0x8] sm:$0xff] %v1775_v39  }
 0x28e PF: > { %s21_s30 = sadd.s32 1, %s1893_s30  }
 0x28f   : > { %p18_p7 = scmp.ge.s32.totalorder %s21_s30, 4  }
 0x291   :  { %20 = sbr.rel (!%p18_p7) target bundleno = 2 (0x2), region = 95 }
 0x296   :  { %1254 = vsyncpa [#allocation3], 1 }
 0x297   :  { %1256 = vsyncpa [#allocation3 + $0x1], 1 }
 0x298   :  { %1257 = vsyncpa [#allocation5], 1 }

</bundles_post_ra>
